<compile_context>
chip_gen: v5e
topology: v5e:2x2
jax: 0.10.0
libtpu: 0.0.40
codegen_flags: <defaults>
</compile_context>

<pallas_src>
import jax
import jax.numpy as jnp
from jax.experimental import pallas as pl
from jax.experimental.pallas import tpu as pltpu

_LANE_WIDTHS = (1536, 768, 384)       # multiples of lcm(3, 128) = 384
_MAX_BLOCK_ROWS = 1024                # 1024 * 1536 * 4 B = 6 MiB per f32 buffer
_MAX_BLOCK_BYTES = 6 * 1024 * 1024    # per-buffer cap (keeps v7x VMEM happy)
_PALLAS_MIN_ELEMS = 1 << 21           # below this XLA's fused add already wins
_SUBLANE = {1: 32, 2: 16, 4: 8, 8: 8}


def _cdiv(a, b):
    return -(-a // b)


def _round_up(x, m):
    return _cdiv(x, m) * m


def _choose_lane_width(total):
    for w in _LANE_WIDTHS:
        if total % w == 0:
            return w
    return None


def _ambient_kernel(light_ref, amb_ref, out_ref):
    # Pure elementwise broadcast-add; DMA-bound, body is trivially at roofline.
    out_ref[...] = light_ref[...] + amb_ref[...]


def ambient_lighting_pallas(light, light_intensity=0.5,
                            light_color=(1.0, 1.0, 1.0)):
    """Pallas path: light [B, N, 3] -> light + intensity * color (free views)."""
    B, N, C = light.shape
    if C != 3:
        raise ValueError("ambient_lighting expects RGB channels-last (C == 3)")
    dtype = light.dtype
    itemsize = jnp.dtype(dtype).itemsize

    total = B * N * C
    W = _choose_lane_width(total)
    if W is None:
        raise ValueError(
            "element count not divisible by 384; use ambient_lighting() "
            "which falls back to XLA for this shape.")

    rows = total // W
    sublane = _SUBLANE.get(itemsize, 8)

    # Row-block size: large (amortize ~0.35us per-step overhead), capped by a
    # per-buffer byte budget, and small enough that the grid has >= 2 steps
    # when possible so both v7x TensorCores participate ("parallel" axis).
    rows_cap = max(sublane, _MAX_BLOCK_BYTES // (W * itemsize))
    block_rows = min(_MAX_BLOCK_ROWS, rows_cap,
                     _round_up(_cdiv(rows, 2), sublane))
    block_rows = max(block_rows, sublane)
    grid = (_cdiv(rows, block_rows),)

    # Free row-major view: [B, N, 3] -> [rows, W].  Every slab row starts at
    # channel 0 because W % 3 == 0, so the ambient row lines up exactly.
    # (JAX arrays are logically row-major, so this reshape never reorders.)
    slab = light.reshape(rows, W)

    # Ambient row: intensity * color tiled across W lanes.  Passed as a tiny
    # input (not closed over) so traced / changing parameters don't recompile.
    amb3 = (jnp.asarray(light_intensity, dtype=dtype)
            * jnp.asarray(light_color, dtype=dtype).reshape(3))
    amb_row = jnp.tile(amb3, W // 3).reshape(1, W)

    block_bytes = block_rows * W * itemsize
    # double-buffered light in + out, double-buffered ambient row, + headroom
    vmem_limit = min(32 << 20,
                     max(8 << 20, 4 * block_bytes + 4 * W * itemsize + (2 << 20)))

    out_slab = pl.pallas_call(
        _ambient_kernel,
        out_shape=jax.ShapeDtypeStruct((rows, W), dtype),
        grid=grid,
        in_specs=[pl.BlockSpec((block_rows, W), lambda r: (r, 0)),
                  pl.BlockSpec((1, W), lambda r: (0, 0))],
        out_specs=pl.BlockSpec((block_rows, W), lambda r: (r, 0)),
        compiler_params=pltpu.CompilerParams(
            dimension_semantics=("parallel",),
            vmem_limit_bytes=vmem_limit),
    )(slab, amb_row)

    return out_slab.reshape(B, N, C)      # free view back to the input shape


def ambient_lighting(light, light_intensity=0.5, light_color=(1.0, 1.0, 1.0)):
    """Size/layout-dispatching wrapper (module-equivalent forward)."""
    total = light.size
    if total >= _PALLAS_MIN_ELEMS and _choose_lane_width(total) is not None:
        return ambient_lighting_pallas(light, light_intensity, light_color)
    # XLA's fused broadcast-add is already at HBM roofline for this op.
    amb = (jnp.asarray(light_intensity, dtype=light.dtype)
           * jnp.asarray(light_color, dtype=light.dtype))
    return light + amb.reshape((1,) * (light.ndim - 1) + (-1,))


class AmbientLighting:
    """Drop-in analogue of the PyTorch module."""

    def __init__(self, light_intensity=0.5, light_color=(1, 1, 1)):
        self.light_intensity = light_intensity
        self.light_color = light_color

    def __call__(self, light):
        return ambient_lighting(light, self.light_intensity, self.light_color)


def ambient_lighting_ref(light, light_intensity=0.5,
                         light_color=(1.0, 1.0, 1.0)):
    amb = light_intensity * jnp.asarray(light_color, dtype=light.dtype)
    return light + amb[None, None, :]


if __name__ == "__main__":
    key = jax.random.PRNGKey(0)

    # --- Pallas path (forced): lane-dense shape, 2-step parallel grid ---
    B, N, C = 2, 4096, 3            # total = 24576 = 16 * 1536 -> rows=16, grid=(2,)
    light = jax.random.normal(key, (B, N, C), dtype=jnp.float32)
    intensity = 0.7
    color = (0.9, 0.5, 0.2)

    out = jax.block_until_ready(ambient_lighting_pallas(light, intensity, color))
    ref = ambient_lighting_ref(light, intensity, color)
    assert out.shape == (B, N, C)
    assert jnp.allclose(out, ref, atol=1e-6, rtol=1e-6)

    # --- Module-style wrapper on a tiny input (plain-XLA fast path) ---
    module = AmbientLighting(light_intensity=0.5, light_color=(1.0, 1.0, 1.0))
    light_small = jax.random.normal(jax.random.PRNGKey(1), (2, 16, 3),
                                    dtype=jnp.float32)
    out_small = jax.block_until_ready(module(light_small))
    ref_small = ambient_lighting_ref(light_small)
    assert jnp.allclose(out_small, ref_small, atol=1e-6, rtol=1e-6)

    print("KERNEL_OK")
</pallas_src>

<mosaic_0001>
module attributes {stable_mosaic.version = 11 : i64} {
  func.func @_ambient_kernel(%arg0: i32, %arg1: memref<8x1536xf32, #tpu.memory_space<vmem>>, %arg2: memref<1x1536xf32, #tpu.memory_space<vmem>>, %arg3: memref<8x1536xf32, #tpu.memory_space<vmem>>) attributes {dimension_semantics = [#tpu.dimension_semantics<parallel>], iteration_bounds = array<i64: 2>, scalar_prefetch = 0 : i64, scratch_operands = 0 : i64, tpu.core_type = #tpu.core_type<tc>, window_params = [{transform_indices = @transform_0, window_bounds = array<i64: 8, 1536>}, {pipeline_mode = #tpu.pipeline_mode<synchronous>, transform_indices = @transform_1, window_bounds = array<i64: 1, 1536>}, {transform_indices = @transform_2, window_bounds = array<i64: 8, 1536>}]} {
    %c0 = arith.constant 0 : index
    %c0_0 = arith.constant 0 : index
    %0 = vector.load %arg1[%c0, %c0_0] : memref<8x1536xf32, #tpu.memory_space<vmem>>, vector<8x1536xf32>
    %c0_1 = arith.constant 0 : index
    %c0_2 = arith.constant 0 : index
    %1 = vector.load %arg2[%c0_1, %c0_2] : memref<1x1536xf32, #tpu.memory_space<vmem>>, vector<1x1536xf32>
    %2 = vector.broadcast %1 : vector<1x1536xf32> to vector<8x1536xf32>
    %3 = arith.addf %0, %2 : vector<8x1536xf32>
    %c0_3 = arith.constant 0 : index
    %c0_4 = arith.constant 0 : index
    %4 = vector.load %arg3[%c0_3, %c0_4] : memref<8x1536xf32, #tpu.memory_space<vmem>>, vector<8x1536xf32>
    tpu.vector_store %arg3[%c0_3, %c0_4], %3 {strides = array<i32>} : memref<8x1536xf32, #tpu.memory_space<vmem>>, vector<8x1536xf32>,
    return
  }
  func.func @transform_0(%arg0: i32) -> (i32, i32) {
    %c0_i32 = arith.constant 0 : i32
    %c0_i32_0 = arith.constant 0 : i32
    return %arg0, %c0_i32 : i32, i32
  }
  func.func @transform_1(%arg0: i32) -> (i32, i32) {
    %c0_i32 = arith.constant 0 : i32
    %c0_i32_0 = arith.constant 0 : i32
    %c0_i32_1 = arith.constant 0 : i32
    return %c0_i32, %c0_i32_0 : i32, i32
  }
  func.func @transform_2(%arg0: i32) -> (i32, i32) {
    %c0_i32 = arith.constant 0 : i32
    %c0_i32_0 = arith.constant 0 : i32
    return %arg0, %c0_i32 : i32, i32
  }
}

</mosaic_0001>

<bundles_post_ra>
// kernel: tpu_custom_call.1
= control target key start
LH: loop header
LB: loop body
LE: loop exit
PB: predicated region body
PF: predicated region fallthrough
CT: control target
= control target key end

     0   :  { %7 = vsyncpa [#allocation3], 0  ;;  %s724_s0 = inlined_call_operand.hbm [shape: f32[16,1536], index: 0, kind: input, shape index: {}]   ;;  %s725_s1 = inlined_call_operand.hbm [shape: f32[1,1536], index: 1, kind: input, shape index: {}]   ;;  %s726_s2 = inlined_call_operand.hbm [shape: f32[16,1536], index: 2, kind: output, shape index: {}]  }
   0x1   :  { %9 = vsyncpa [#allocation3 + $0x1], 0 }
   0x2   :  { %10 = vsyncpa [#allocation6], 0 }
   0x3   :  { %11 = vsyncpa [#allocation4], 0 }
   0x4   :  { %13 = vsyncpa [#allocation4 + $0x1], 0  ;;  %s557_s9 = smov 0   ;;  %s559_s10 = smov 0  }
   0x5   :  { %s561_s11 = smov 0   ;;  %s563_s12 = smov 0  }
   0x6 LB: > { %s578_s13 = sadd.s32 4294967295, %s539_s12   ;;  %s338_s14 = sadd.s32 4294967294, %s539_s12   ;;  %s539_s12 = sphi %s563_s12, %s736_s12   ;;  %s535_s11 = sphi %s561_s11, %s735_s11   ;;  %s531_s10 = sphi %s559_s10, %s734_s10   ;;  %s527_s9 = sphi %s557_s9, %s733_s9  }
   0x7   : > { %p39_p0 = scmp.ne.s32.totalorder %s531_s10, %s527_s9  ;;  %p40_p1 = scmp.eq.s32.totalorder %s578_s13, 0 }
   0x8   : > { %p84_p2 = scmp.eq.s32.totalorder %s578_s13, 1  ;;  %p90_p3 = scmp.eq.s32.totalorder %s338_s14, 1 }
   0x9   : > { %p587_p4 = por %p40_p1, %p39_p0  ;;  %p339_p5 = scmp.ge.s32.totalorder %s539_s12, 1 }
   0xa   : > { %p592_p6 = por %p90_p3, %p39_p0  ;;  %p97_p7 = scmp.lt.s32.totalorder %s539_s12, 3 }
   0xb   : > { %s109_s19 = sshll.u32 %s725_s1, 4  ;;  %s541_s21 = smov [#allocation5]   ;;  %s110_s19 = int_to_ptr.hbm [resolvable:$true] %s109_s19 }
   0xc   : > { %p600_p8 = pnand %p339_p5, %p97_p7  ;;  %s111_s22 = sshll.u32 %s541_s21, 4  ;;  %s112_s22 = int_to_ptr.vmem [resolvable:$true] %s111_s22 }
   0xd   : > { %s610_s23 = sadd.s32 1, %s539_s12   ;;  %s26_s24 = sadd.s32 1, %s535_s11 }
   0xe   : > { %p360_p10 = pneg %p600_p8  ;;  %s23_s25 = ssub.s32 %s539_s12, %s610_s23 }
   0xf   : > { %p24_p12 = scmp.eq.s32.totalorder %s23_s25, 0  ;;  %p33_p13 = scmp.ne.s32.totalorder %s535_s11, %s531_s10 }
  0x10   : > { %p361_p11 = pnand %p360_p10, %p40_p1  ;;  %p34_p0 = scmp.eq.s32.totalorder %s539_s12, 0 }
  0x11   : > { %p373_p3 = scmp.lt.s32.totalorder %s539_s12, 2  ;;  %p624_p7 = por %p84_p2, %p33_p13 }
  0x12   : > { %363 = dma.hbm_to_vmem [thread:$0]  (!%p361_p11), %s110_s19, 192, %s112_s22, [#allocation6]  }
  0x13   : > { %s620_s26 = scalar_select %p24_p12, %s535_s11, %s26_s24  }
  0x14   : > { %p35_p5 = por %p34_p0, %p33_p13  ;;  %s122_s28 = sand.u32 1, %s535_s11  }
  0x15   : > { %s349_s29 = smul.u32 96, %s539_s12  ;;  %s123_s17 = scalar_lea.sflag [#allocation3], %s122_s28 }
  0x16   : > { %s348_s30 = smul.u32 96, %s122_s28  ;;  %p633_p10 = pnand %p373_p3, %p35_p5 }
  0x17   : > { %s131_s5 = scalar_lea.hbm %s724_s0, %s349_s29  ;;  %s446_s24 = scalar_lea.hbm %s724_s0, 192 }
  0x18   : > { %s133_s7 = sshll.u32 %s131_s5, 4  ;;  %s126_s8 = scalar_lea.vmem [#allocation2], %s348_s30  ;;  %s134_s7 = int_to_ptr.hbm [resolvable:$true] %s133_s7 }
  0x19   : > { %s135_s14 = sshll.u32 %s126_s8, 4  ;;  %s439_s18 = sshra.s32 %s134_s7, 4  ;;  %s136_s14 = int_to_ptr.vmem [resolvable:$true] %s135_s14  ;;  %s440_s18 = int_to_ptr.hbm [resolvable:$true] %s439_s18 }
  0x1a   : > { %s441_s19 = scalar_lea.hbm %s440_s18, 96  ;;  %p443_p11 = pneg %p633_p10 }
  0x1b   : > { %p442_p2 = scmp.ne.s32.totalorder %s440_s18, %s441_s19  ;;  %p447_p0 = scmp.lt.s32.totalorder %s440_s18, %s724_s0 }
  0x1c   : > { %p448_p3 = scmp.lt.s32.totalorder %s446_s24, %s441_s19 }
  0x1d   : > { %p444_p12 = pnand %p443_p11, %p442_p2 }
  0x1e   : > { %p449_p5 = por %p448_p3, %p447_p0 }
  0x1f   : > { %p445_p13 = pneg %p444_p12 }
  0x21   : > { %p450_p9 = pnand %p449_p5, %p445_p13 }
  0x23   : > { %453 = shalt.err (!%p450_p9)
}
  0x24   : > { %367 = dma.hbm_to_vmem [thread:$0]  (!%p633_p10), %s134_s7, 1536, %s136_s14, %s123_s17  }
  0x25   : > { %144 = sbr.rel (%p600_p8) target bundleno = 65 (0x41), region = 28  ;;  %s650_s28 = sand.u32 (!%p600_p8), 1, %s531_s10  }
  0x26   : > { %s350_s30 = smul.u32 (!%p600_p8), 96, %s650_s28  ;;  %s147_s3 = scalar_lea.sflag (!%p600_p8), [#allocation3], %s650_s28 }
  0x28   : > { %s654_s4 = scalar_lea.vmem (!%p600_p8), [#allocation2], %s350_s30 }
  0x2a   : > { %514 = dma.done.wait (%p587_p4), %s147_s3, 1536  }
  0x2b   : > { %516 = vsyncadd (%p587_p4), %s147_s3, 4294965760 }
  0x2c   : > { %518 = dma.done.wait (%p40_p1), [#allocation6], 192  }
  0x2d   : > { %520 = vsyncadd (%p40_p1), [#allocation6], 4294967104  ;;  %v177_v0 = vld [vmem:[%s654_s4] sm:$0xff]  ;;  %v178_v2 = vld [vmem:[%s654_s4 + $0x8] sm:$0xff]  ;;  %s351_s15 = smul.u32 96, %s578_s13  ;;  %s672_s20 = scalar_lea.vmem [#allocation7], %s350_s30 }
  0x2e   : > { %v189_v1 = vld [vmem:[#allocation5] sm:$0xff]  ;;  %v179_v5 = vld [vmem:[%s654_s4 + $0x10] sm:$0xff]  ;;  %v180_v7 = vld [vmem:[%s654_s4 + $0x18] sm:$0xff]  ;;  %s255_s7 = sshll.u32 %s672_s20, 4  ;;  %s242_s14 = scalar_lea.sflag [#allocation4], %s650_s28  ;;  %s256_s7 = int_to_ptr.vmem [resolvable:$true] %s255_s7 }
  0x2f   : > { %v193_v3 = vperm.slane %v189_v1, 0  ;;  %v194_v4 = vperm.slane %v189_v1, 1  ;;  %v195_v6 = vperm.slane %v189_v1, 2  ;;  %v196_v8 = vperm.slane %v189_v1, 3  ;;  %v181_v9 = vld [vmem:[%s654_s4 + $0x20] sm:$0xff]  ;;  %v182_v15 = vld [vmem:[%s654_s4 + $0x28] sm:$0xff]  ;;  %s253_s6 = scalar_lea.hbm %s726_s2, %s351_s15 }
  0x30   : > { %v197_v10 = vperm.slane %v189_v1, 4  ;;  %v198_v11 = vperm.slane %v189_v1, 5  ;;  %v199_v16 = vperm.slane %v189_v1, 6  ;;  %v190_v17 = vld [vmem:[#allocation5 + $0x8] sm:$0xf]  ;;  %v183_v19 = vld [vmem:[%s654_s4 + $0x30] sm:$0xff] }
  0x31   : > { %v217_v12 = vadd.f32 %v193_v3, %v177_v0  ;;  %v218_v13 = vadd.f32 %v194_v4, %v178_v2  ;;  %v219_v14 = vadd.f32 %v195_v6, %v179_v5  ;;  %v220_v18 = vadd.f32 %v196_v8, %v180_v7  ;;  %v184_v22 = vld [vmem:[%s654_s4 + $0x38] sm:$0xff]  ;;  %v185_v25 = vld [vmem:[%s654_s4 + $0x40] sm:$0xff]  ;;  %v186_v28 = vld [vmem:[%s654_s4 + $0x48] sm:$0xff]  ;;  %s257_s8 = sshll.u32 %s253_s6, 4  ;;  %s489_s22 = scalar_lea.hbm %s726_s2, 192  ;;  %s258_s8 = int_to_ptr.hbm [resolvable:$true] %s257_s8 }
  0x32   : > { %v200_v20 = vperm.slane %v189_v1, 7  ;;  %v221_v21 = vadd.f32 %v197_v10, %v181_v9  ;;  %v201_v23 = vperm.slane %v190_v17, 0  ;;  %v222_v24 = vadd.f32 %v198_v11, %v182_v15  ;;  %v187_v31 = vld [vmem:[%s654_s4 + $0x50] sm:$0xff]  ;;  %v188_v34 = vld [vmem:[%s654_s4 + $0x58] sm:$0xff]  ;;  %s483_s17 = sshra.s32 %s258_s8, 4  ;;  %s484_s17 = int_to_ptr.hbm [resolvable:$true] %s483_s17 }
  0x33   : > { %229 = vst [vmem:[%s672_s20] sm:$0xff] %v217_v12  ;;  %v202_v26 = vperm.slane %v190_v17, 1  ;;  %v223_v27 = vadd.f32 %v199_v16, %v183_v19  ;;  %v203_v29 = vperm.slane %v190_v17, 2  ;;  %v204_v32 = vperm.slane %v190_v17, 3  ;;  %s485_s18 = scalar_lea.hbm %s484_s17, 96  ;;  %p490_p9 = scmp.lt.s32.totalorder %s484_s17, %s726_s2 }
  0x34   : > { %230 = vst [vmem:[%s672_s20 + $0x8] sm:$0xff] %v218_v13  ;;  %v224_v30 = vadd.f32 %v200_v20, %v184_v22  ;;  %v225_v33 = vadd.f32 %v201_v23, %v185_v25  ;;  %p486_p1 = scmp.ne.s32.totalorder %s484_s17, %s485_s18  ;;  %p491_p10 = scmp.lt.s32.totalorder %s489_s22, %s485_s18 }
  0x35   : > { %231 = vst [vmem:[%s672_s20 + $0x10] sm:$0xff] %v219_v14  ;;  %v226_v35 = vadd.f32 %v202_v26, %v186_v28  ;;  %v227_v36 = vadd.f32 %v203_v29, %v187_v31  ;;  %v228_v37 = vadd.f32 %v204_v32, %v188_v34 }
  0x36   : > { %232 = vst [vmem:[%s672_s20 + $0x18] sm:$0xff] %v220_v18  ;;  %p487_p4 = pnand %p486_p1, %p624_p7  ;;  %p492_p2 = por %p491_p10, %p490_p9 }
  0x37   : > { %233 = vst [vmem:[%s672_s20 + $0x20] sm:$0xff] %v221_v21 }
  0x38   : > { %234 = vst [vmem:[%s672_s20 + $0x28] sm:$0xff] %v222_v24  ;;  %p488_p8 = pneg %p487_p4 }
  0x39   : > { %235 = vst [vmem:[%s672_s20 + $0x30] sm:$0xff] %v223_v27 }
  0x3a   : > { %236 = vst [vmem:[%s672_s20 + $0x38] sm:$0xff] %v224_v30  ;;  %p493_p11 = pnand %p492_p2, %p488_p8 }
  0x3b   : > { %237 = vst [vmem:[%s672_s20 + $0x40] sm:$0xff] %v225_v33 }
  0x3c   : > { %238 = vst [vmem:[%s672_s20 + $0x48] sm:$0xff] %v226_v35 }
  0x3d   : > { %239 = vst [vmem:[%s672_s20 + $0x50] sm:$0xff] %v227_v36 }
  0x3e   : > { %240 = vst [vmem:[%s672_s20 + $0x58] sm:$0xff] %v228_v37 }
  0x3f   : > { %496 = shalt.err (!%p493_p11)
}
  0x40   : > { %358 = dma.vmem_to_hbm [thread:$0]  (%p624_p7), %s256_s7, 1536, %s258_s8, %s242_s14  }
  0x41 PF: > { %s269_s29 = sand.u32 1, %s527_s9   ;;  %p732_p12 = scmp.ge.s32.totalorder %s539_s12, 2 }
  0x42   : > { %s270_s28 = scalar_lea.sflag [#allocation4], %s269_s29 }
  0x43   : > { %p369_p13 = pnand %p732_p12, %p592_p6 }
  0x45   : > { %p370_p0 = pneg %p369_p13 }
  0x47   : > { %522 = dma.done.wait (%p370_p0), %s270_s28, 1536  }
  0x48   : > { %524 = vsyncadd (%p370_p0), %s270_s28, 4294965760  ;;  %p16_p3 = scmp.ge.s32.totalorder %s610_s23, 4   ;;  %s733_s9 = smov %s531_s10 }
  0x49   : > { %s734_s10 = smov %s535_s11  ;;  %s735_s11 = smov %s620_s26 }
  0x4a   : > { %s736_s12 = smov %s610_s23  ;;  %18 = sbr.rel (!%p16_p3) target bundleno = 6 (0x6), region = 77 }
  0x4f   :  { %276 = vsyncpa [#allocation3], 1 }
  0x50   :  { %278 = vsyncpa [#allocation3 + $0x1], 1 }
  0x51   :  { %279 = vsyncpa [#allocation6], 1 }
  0x52   :  { %280 = vsyncpa [#allocation4], 1 }
  0x53   :  { %282 = vsyncpa [#allocation4 + $0x1], 1 }

</bundles_post_ra>
